<compile_context>
chip_gen: v6e
topology: v6e:2x2x1
jax: 0.10.0
libtpu: 0.0.40
codegen_flags: <defaults>
</compile_context>

<pallas_src>
import functools

import jax
import jax.numpy as jnp
from jax import lax
from jax.experimental import pallas as pl
from jax.experimental.pallas import tpu as pltpu


def _round_up(a, b):
    return (a + b - 1) // b * b


# ----------------------------- activation pre-pass ----------------------------

def _act_q_kernel(x_ref, qc_ref, rsum_ref, *, act_scale, act_zero_point):
    """Static per-tensor uint8 quantize; emit (q - zp_a) as exact bf16 integers and
    the per-row sum (f32) accumulated across the K grid axis."""
    x = x_ref[...]                                                       # [pm, pk] f32
    q = jnp.clip(jnp.round(x / act_scale) + act_zero_point, 0.0, 255.0)
    qc = q - act_zero_point                                              # in [-255, 255]
    qc_ref[...] = qc.astype(jnp.bfloat16)                                # exact in bf16
    partial = jnp.sum(qc, axis=1, keepdims=True)                         # [pm, 1] f32

    k = pl.program_id(1)

    @pl.when(k == 0)
    def _():
        rsum_ref[...] = partial

    @pl.when(k > 0)
    def _():
        rsum_ref[...] += partial


# ------------------------------ main matmul kernel ----------------------------

def _qlinear_kernel(qc_ref, qwT_ref, rsum_ref, coef_ref, o_ref, acc_ref):
    """acc += (q_x - zp_a) @ (q_W - 128)^T ; epilogue applies fused scales, zero-point
    correction (via the precomputed rowsum) and bias."""
    k = pl.program_id(2)

    @pl.when(k == 0)
    def _():
        acc_ref[...] = jnp.zeros_like(acc_ref)

    # single cast: signed int8 weight tile -> bf16 (values in [-128, 127] are exact)
    acc_ref[...] += lax.dot_general(
        qc_ref[...], qwT_ref[...].astype(jnp.bfloat16),
        dimension_numbers=(((1,), (0,)), ((), ())),                      # [tm,tk] x [tk,tn]
        preferred_element_type=jnp.float32)

    @pl.when(k == pl.num_programs(2) - 1)
    def _():
        scale = coef_ref[0:1, :]     # s_a * s_w                       [1, tn]
        zcorr = coef_ref[1:2, :]     # s_a * s_w * (zp_w - 128)        [1, tn]
        b = coef_ref[2:3, :]         # bias                            [1, tn]
        o_ref[...] = (acc_ref[...] * scale - rsum_ref[...] * zcorr + b
                      ).astype(o_ref.dtype)


# ----------------------- one-time (init-time) weight prep ---------------------

def prepare_quantized_linear(qweight, w_scale, w_zp, bias, act_scale, act_zero_point,
                             *, tn=256, tk_cap=2048, full_k_limit=4096):
    """All O(N*K) weight-side work happens once here, not per forward call."""
    N, K = qweight.shape

    Np = _round_up(N, 128)
    tn = min(tn, Np)
    # keep >= 2 blocks along a parallel grid axis when N allows (2-TC chips / megacore)
    if Np // tn < 2 and Np >= 256 and (Np // 2) % 128 == 0:
        tn = Np // 2

    Kp0 = _round_up(K, 128)
    tk = Kp0 if Kp0 <= full_k_limit else tk_cap       # full-K residency when it fits
    Kp = _round_up(K, tk)

    # shift to signed int8 so the in-kernel cast is a single exact i8 -> bf16 convert
    qw_s = (qweight.astype(jnp.int32) - 128).astype(jnp.int8)            # [N, K]
    qwT = jnp.pad(qw_s.T, ((0, Kp - K), (0, Np - N)))                    # [Kp, Np] int8

    s_a = float(act_scale)
    scale = s_a * w_scale.astype(jnp.float32)                            # [N]
    zcorr = scale * (w_zp.astype(jnp.float32) - 128.0)                   # [N]
    coef = jnp.stack([scale, zcorr, bias.astype(jnp.float32)])           # [3, N]
    coef = jnp.pad(coef, ((0, 0), (0, Np - N)))                          # [3, Np]

    return dict(qwT=qwT, coef=coef, N=N, K=K, Np=Np, Kp=Kp, tn=tn, tk=tk,
                act_scale=s_a, act_zero_point=float(act_zero_point))


# ---------------------------------- forward -----------------------------------

def quantized_linear_forward(state, x, *, tm=256):
    """x: [M, K] float. Returns [M, N] float32."""
    M, K = x.shape
    assert K == state["K"]
    Kp, Np, tk, tn = state["Kp"], state["Np"], state["tk"], state["tn"]

    tm = min(tm, _round_up(M, 16))     # bf16 sublane packing
    assert tm % 16 == 0
    Mp = _round_up(M, tm)

    # Zero padding is inert: padded x columns quantize to q == zp_a so (q - zp_a) == 0,
    # contributing 0 to both the matmul and the rowsum.
    x_p = jnp.pad(x.astype(jnp.float32), ((0, Mp - M), (0, Kp - K)))

    # ---- pre-pass: per-tensor quantize, emit (q - zp_a) bf16 + per-row sum f32 ----
    act_kernel = functools.partial(
        _act_q_kernel,
        act_scale=state["act_scale"],
        act_zero_point=state["act_zero_point"])
    qc, rsum = pl.pallas_call(
        act_kernel,
        out_shape=(jax.ShapeDtypeStruct((Mp, Kp), jnp.bfloat16),
                   jax.ShapeDtypeStruct((Mp, 1), jnp.float32)),
        grid=(Mp // tm, Kp // tk),
        in_specs=[pl.BlockSpec((tm, tk), lambda i, k: (i, k))],
        out_specs=[pl.BlockSpec((tm, tk), lambda i, k: (i, k)),
                   pl.BlockSpec((tm, 1), lambda i, k: (i, 0))],
        compiler_params=pltpu.CompilerParams(
            dimension_semantics=("parallel", "arbitrary"),
            vmem_limit_bytes=48 * 1024 * 1024),
    )(x_p)

    # ---- tiled quantized matmul ----
    out_p = pl.pallas_call(
        _qlinear_kernel,
        out_shape=jax.ShapeDtypeStruct((Mp, Np), jnp.float32),
        grid_spec=pltpu.PrefetchScalarGridSpec(
            num_scalar_prefetch=0,
            grid=(Mp // tm, Np // tn, Kp // tk),
            in_specs=[
                pl.BlockSpec((tm, tk), lambda i, j, k: (i, k)),   # (q_x - zp_a), bf16
                pl.BlockSpec((tk, tn), lambda i, j, k: (k, j)),   # signed int8 weight [K,N]
                pl.BlockSpec((tm, 1), lambda i, j, k: (i, 0)),    # rowsum(q_x - zp_a)
                pl.BlockSpec((3, tn), lambda i, j, k: (0, j)),    # scale / zp-corr / bias
            ],
            out_specs=pl.BlockSpec((tm, tn), lambda i, j, k: (i, j)),
            scratch_shapes=[pltpu.VMEM((tm, tn), jnp.float32)],   # f32 accumulator
        ),
        compiler_params=pltpu.CompilerParams(
            dimension_semantics=("parallel", "parallel", "arbitrary"),
            vmem_limit_bytes=48 * 1024 * 1024),
    )(qc, state["qwT"], rsum, state["coef"])

    return out_p[:M, :state["N"]]


# ------------------------- observer / quantizer glue --------------------------

def _minmax_qparams(t, axis=None, qmin=0, qmax=255, eps=1e-8):
    """MinMax observer -> affine uint8 qparams (range always includes 0)."""
    keep = axis is not None
    t_min = jnp.minimum(t.min(axis=axis, keepdims=keep), 0.0)
    t_max = jnp.maximum(t.max(axis=axis, keepdims=keep), 0.0)
    scale = jnp.maximum((t_max - t_min) / float(qmax - qmin), eps)
    zero_point = jnp.clip(jnp.round(qmin - t_min / scale), qmin, qmax)
    return scale, zero_point


def _quantize_uint8(t, scale, zero_point):
    return jnp.clip(jnp.round(t / scale) + zero_point, 0.0, 255.0).astype(jnp.uint8)


# ---------------------------------- main --------------------------------------

if __name__ == "__main__":
    key = jax.random.PRNGKey(0)
    kx, kw, kb = jax.random.split(key, 3)

    # Small, deliberately unaligned shapes to also exercise the padding path.
    M, K, N = 24, 500, 200                  # tokens=24, in_features=500, out_features=200
    x = jax.random.normal(kx, (M, K), dtype=jnp.float32)
    weight = jax.random.normal(kw, (N, K), dtype=jnp.float32) * 0.1
    bias = jax.random.normal(kb, (N,), dtype=jnp.float32)

    # "calibration": activation observer is per-tensor, weight observer is per-row
    # (block_size = (1, in_features) as in the PyTorch module).
    act_scale, act_zp = _minmax_qparams(x, axis=None)
    w_scale2d, w_zp2d = _minmax_qparams(weight, axis=1)          # [N,1]
    w_scale, w_zp = w_scale2d[:, 0], w_zp2d[:, 0]                # [N]

    # weight quantization happens at module __init__ time (stored as uint8)
    qweight = _quantize_uint8(weight, w_scale2d, w_zp2d)         # [N,K] uint8

    # one-time weight prep (pad / transpose / pack epilogue constants)
    state = prepare_quantized_linear(qweight, w_scale, w_zp, bias,
                                     float(act_scale), float(act_zp))

    out = quantized_linear_forward(state, x)
    out = jax.block_until_ready(out)
    assert out.shape == (M, N) and out.dtype == jnp.float32

    # reference: exact f32 static-quant math (module semantics)
    qx = jnp.clip(jnp.round(x / float(act_scale)) + float(act_zp), 0.0, 255.0)
    dqx = (qx - float(act_zp)) * float(act_scale)
    dqw = (qweight.astype(jnp.float32) - w_zp[:, None]) * w_scale[:, None]
    ref = jnp.dot(dqx, dqw.T, precision=jax.lax.Precision.HIGHEST) + bias[None, :]

    assert jnp.allclose(out, ref, atol=5e-3, rtol=5e-3), "mismatch vs exact f32 reference"

    print("KERNEL_OK")
</pallas_src>

<mosaic_0001>
module attributes {stable_mosaic.version = 11 : i64} {
  func.func @_act_q_kernel(%arg0: i32, %arg1: i32, %arg2: memref<32x512xf32, #tpu.memory_space<vmem>>, %arg3: memref<32x512xbf16, #tpu.memory_space<vmem>>, %arg4: memref<32x1xf32, #tpu.memory_space<vmem>>) attributes {dimension_semantics = [#tpu.dimension_semantics<parallel>, #tpu.dimension_semantics<arbitrary>], iteration_bounds = array<i64: 1, 1>, scalar_prefetch = 0 : i64, scratch_operands = 0 : i64, tpu.core_type = #tpu.core_type<tc>, window_params = [{transform_indices = @transform_0, window_bounds = array<i64: 32, 512>}, {transform_indices = @transform_1, window_bounds = array<i64: 32, 512>}, {transform_indices = @transform_2, window_bounds = array<i64: 32, 1>}]} {
    %c0 = arith.constant 0 : index
    %c0_0 = arith.constant 0 : index
    %0 = vector.load %arg2[%c0, %c0_0] : memref<32x512xf32, #tpu.memory_space<vmem>>, vector<32x512xf32>
    %cst = arith.constant 0.0299744774 : f32
    %1 = vector.broadcast %cst : f32 to vector<32x512xf32>
    %2 = arith.divf %0, %1 : vector<32x512xf32>
    %3 = math.roundeven %2 : vector<32x512xf32>
    %cst_1 = arith.constant 1.290000e+02 : f32
    %4 = vector.broadcast %cst_1 : f32 to vector<32x512xf32>
    %5 = arith.addf %3, %4 : vector<32x512xf32>
    %cst_2 = arith.constant 0.000000e+00 : f32
    %cst_3 = arith.constant 2.550000e+02 : f32
    %6 = vector.broadcast %cst_2 : f32 to vector<32x512xf32>
    %7 = arith.maximumf %6, %5 : vector<32x512xf32>
    %8 = vector.broadcast %cst_3 : f32 to vector<32x512xf32>
    %9 = arith.minimumf %8, %7 : vector<32x512xf32>
    %cst_4 = arith.constant 1.290000e+02 : f32
    %10 = vector.broadcast %cst_4 : f32 to vector<32x512xf32>
    %11 = arith.subf %9, %10 : vector<32x512xf32>
    %12 = arith.truncf %11 : vector<32x512xf32> to vector<32x512xbf16>
    %c0_5 = arith.constant 0 : index
    %c0_6 = arith.constant 0 : index
    %13 = vector.load %arg3[%c0_5, %c0_6] : memref<32x512xbf16, #tpu.memory_space<vmem>>, vector<32x512xbf16>
    tpu.vector_store %arg3[%c0_5, %c0_6], %12 {strides = array<i32>} : memref<32x512xbf16, #tpu.memory_space<vmem>>, vector<32x512xbf16>,
    %cst_7 = arith.constant dense<0.000000e+00> : vector<32xf32>
    %14 = vector.multi_reduction <add>, %11, %cst_7 [1] : vector<32x512xf32> to vector<32xf32>
    %15 = vector.shape_cast %14 : vector<32xf32> to vector<32x1xf32>
    %c0_i32 = arith.constant 0 : i32
    %16 = arith.cmpi eq, %arg1, %c0_i32 : i32
    %17 = arith.extui %16 : i1 to i32
    %c0_i32_8 = arith.constant 0 : i32
    %18 = arith.cmpi ne, %17, %c0_i32_8 : i32
    scf.if %18 {
      %c0_11 = arith.constant 0 : index
      %c0_12 = arith.constant 0 : index
      %22 = vector.load %arg4[%c0_11, %c0_12] : memref<32x1xf32, #tpu.memory_space<vmem>>, vector<32x1xf32>
      tpu.vector_store %arg4[%c0_11, %c0_12], %15 {strides = array<i32>} : memref<32x1xf32, #tpu.memory_space<vmem>>, vector<32x1xf32>,
    } else {
    }
    %c0_i32_9 = arith.constant 0 : i32
    %19 = arith.cmpi sgt, %arg1, %c0_i32_9 : i32
    %20 = arith.extui %19 : i1 to i32
    %c0_i32_10 = arith.constant 0 : i32
    %21 = arith.cmpi ne, %20, %c0_i32_10 : i32
    scf.if %21 {
      %c0_11 = arith.constant 0 : index
      %c0_12 = arith.constant 0 : index
      %22 = vector.load %arg4[%c0_11, %c0_12] : memref<32x1xf32, #tpu.memory_space<vmem>>, vector<32x1xf32>
      %23 = arith.addf %22, %15 : vector<32x1xf32>
      %c0_13 = arith.constant 0 : index
      %c0_14 = arith.constant 0 : index
      %24 = vector.load %arg4[%c0_13, %c0_14] : memref<32x1xf32, #tpu.memory_space<vmem>>, vector<32x1xf32>
      tpu.vector_store %arg4[%c0_13, %c0_14], %23 {strides = array<i32>} : memref<32x1xf32, #tpu.memory_space<vmem>>, vector<32x1xf32>,
    } else {
    }
    return
  }
  func.func @transform_0(%arg0: i32, %arg1: i32) -> (i32, i32) {
    %c0_i32 = arith.constant 0 : i32
    return %arg0, %arg1 : i32, i32
  }
  func.func @transform_1(%arg0: i32, %arg1: i32) -> (i32, i32) {
    %c0_i32 = arith.constant 0 : i32
    return %arg0, %arg1 : i32, i32
  }
  func.func @transform_2(%arg0: i32, %arg1: i32) -> (i32, i32) {
    %c0_i32 = arith.constant 0 : i32
    %c0_i32_0 = arith.constant 0 : i32
    return %arg0, %c0_i32 : i32, i32
  }
}

</mosaic_0001>

<bundles_post_ra>
// kernel: tpu_custom_call.1
= control target key start
LH: loop header
LB: loop body
LE: loop exit
PB: predicated region body
PF: predicated region fallthrough
CT: control target
= control target key end

     0   :  { %8 = vsyncpa [#allocation3], 0  ;;  %s624_s0 = inlined_call_operand.hbm [shape: f32[32,512], index: 0, kind: input, shape index: {}]   ;;  %s625_s1 = inlined_call_operand.hbm [shape: bf16[32,512], index: 1, kind: output, shape index: {0}]   ;;  %s626_s2 = inlined_call_operand.vmem [shape: f32[32,1], index: 2, kind: output, shape index: {1}]  }
   0x1   :  { %9 = vsyncpa [#allocation4], 0  ;;  %s471_s9 = smov [#allocation2]  }
   0x2   :  { %s15_s10 = sshll.u32 %s471_s9, 4  ;;  %s16_s10 = int_to_ptr.vmem [resolvable:$true] %s15_s10 }
   0x3   :  { %s435_s11 = scalar_lea.vmem %s16_s10, 2048  ;;  %p440_p1 = scmp.lt.s32.totalorder %s16_s10, %s16_s10 }
   0x4   :  { %p436_p0 = scmp.ne.s32.totalorder %s16_s10, %s435_s11  ;;  %p441_p2 = scmp.lt.s32.totalorder %s435_s11, %s435_s11 }
   0x6   :  { %p442_p3 = por %p441_p2, %p440_p1 }
   0x8   :  { %p443_p4 = pnand %p442_p3, %p436_p0 }
   0xa   :  { %446 = shalt.err (!%p443_p4)
}
   0xb   :  { %s472_s12 = smov 512   ;;  %s473_s13 = smov 32  }
   0xc   :  { %21 = dma.hbm_to_vmem [thread:$0]  %s624_s0, 2048, %s16_s10, [#allocation3], %s472_s12, %s472_s12, %s473_s13  }
   0xd   :  { %467 = dma.done.wait [#allocation3], 2048  }
   0xe   :  { %468 = vsyncadd [#allocation3], 4294965248  ;;  %v33_v0 = vld [vmem:[#allocation2 + $0x40] sm:$0xff]  ;;  %v34_v1 = vld [vmem:[#allocation2 + $0x48] sm:$0xff]  ;;  %s474_s0 = smov [#allocation5]  }
   0xf   :  { %v35_v2 = vld [vmem:[#allocation2 + $0x50] sm:$0xff]  ;;  %v36_v3 = vld [vmem:[#allocation2 + $0x58] sm:$0xff]  ;;  %v50_v4 = vmul.f32 33.361717, %v33_v0  ;;  %v51_v5 = vmul.f32 33.361717, %v34_v1 }
  0x10   :  { %v52_v6 = vmul.f32 33.361717, %v35_v2  ;;  %v53_v7 = vmul.f32 33.361717, %v36_v3  ;;  %v25_v14 = vld [vmem:[#allocation2] sm:$0xff]  ;;  %v26_v23 = vld [vmem:[#allocation2 + $0x8] sm:$0xff] }
  0x11   :  { %v357_v8 = vand.u32 2147483647, %v50_v4  ;;  %v359_v9 = vcvt.f32.s32 %v50_v4  ;;  %v365_v10 = vand.u32 2147483647, %v51_v5  ;;  %v367_v11 = vcvt.f32.s32 %v51_v5  ;;  %v27_v24 = vld [vmem:[#allocation2 + $0x10] sm:$0xff]  ;;  %v28_v28 = vld [vmem:[#allocation2 + $0x18] sm:$0xff] }
  0x12   :  { %v373_v12 = vand.u32 2147483647, %v52_v6  ;;  %v375_v13 = vcvt.f32.s32 %v52_v6  ;;  %v362_v17 = vand.u32 2147483648, %v50_v4  ;;  %v370_v18 = vand.u32 2147483648, %v51_v5  ;;  %v38_v31 = vld [vmem:[#allocation2 + $0x68] sm:$0xff]  ;;  %s245_s16 = sshll.u32 %s474_s0, 4  ;;  %s246_s16 = int_to_ptr.vmem [resolvable:$true] %s245_s16 }
  0x13   :  { %vm495_vm0 = vcmp.lt.f32.partialorder %v357_v8, 8388608.0  ;;  %v360_v16 = vcvt.s32.f32 %v359_v9  ;;  %v368_v19 = vcvt.s32.f32 %v367_v11  ;;  %v378_v21 = vand.u32 2147483648, %v52_v6  ;;  %s447_s17 = scalar_lea.vmem %s246_s16, 1024  ;;  %p452_p6 = scmp.lt.s32.totalorder %s246_s16, %s246_s16 }
  0x14   :  { %v376_v20 = vcvt.s32.f32 %v375_v13  ;;  %v381_v22 = vand.u32 2147483647, %v53_v7  ;;  %vm499_vm1 = vcmp.lt.f32.partialorder %v365_v10, 8388608.0  ;;  %v383_v27 = vcvt.f32.s32 %v53_v7  ;;  %p448_p5 = scmp.ne.s32.totalorder %s246_s16, %s447_s17  ;;  %p453_p7 = scmp.lt.s32.totalorder %s447_s17, %s447_s17 }
  0x15   :  { %v361_v25 = vand.u32 2147483647, %v360_v16  ;;  %v503_v29 = vmul.f32 33.361717, %v25_v14  ;;  %v369_v30 = vand.u32 2147483647, %v368_v19 }
  0x16   :  { %vm505_vm2 = vcmp.lt.f32.partialorder %v373_v12, 8388608.0  ;;  %v377_v32 = vand.u32 2147483647, %v376_v20  ;;  %v386_v33 = vand.u32 2147483648, %v53_v7  ;;  %vm509_vm3 = vcmp.lt.f32.partialorder %v381_v22, 8388608.0  ;;  %v37_v22 = vld [vmem:[#allocation2 + $0x60] sm:$0xff]  ;;  %p454_p8 = por %p453_p7, %p452_p6 }
  0x17   :  { %v363_v34 = vor.u32 %v362_v17, %v361_v25  ;;  %v384_v36 = vcvt.s32.f32 %v383_v27  ;;  %v43_v37 = vmul.f32 33.361717, %v26_v23  ;;  %v371_v38 = vor.u32 %v370_v18, %v369_v30 }
  0x18   :  { %v379_v39 = vor.u32 %v378_v21, %v377_v32  ;;  %v513_v40 = vmul.f32 33.361717, %v27_v24  ;;  %v293_v41 = vand.u32 2147483647, %v503_v29  ;;  %v518_v44 = vmul.f32 33.361717, %v28_v28  ;;  %p455_p9 = pnand %p454_p8, %p448_p5 }
  0x19   :  { %v364_v42 = vsel %vm495_vm0, %v363_v34, %v50_v4  ;;  %v385_v43 = vand.u32 2147483647, %v384_v36  ;;  %v295_v45 = vcvt.f32.s32 %v503_v29  ;;  %v372_v46 = vsel %vm499_vm1, %v371_v38, %v51_v5 }
  0x1a   :  { %v380_v47 = vsel %vm505_vm2, %v379_v39, %v52_v6  ;;  %v82_v48 = vadd.f32 129.0, %v364_v42  ;;  %v298_v49 = vand.u32 2147483648, %v503_v29  ;;  %v83_v51 = vadd.f32 129.0, %v372_v46 }
  0x1b   :  { %v387_v50 = vor.u32 %v386_v33, %v385_v43  ;;  %v84_v52 = vadd.f32 129.0, %v380_v47  ;;  %v296_v53 = vcvt.s32.f32 %v295_v45  ;;  %vm526_vm4 = vcmp.lt.f32.partialorder %v293_v41, 8388608.0  ;;  %v39_v41 = vld [vmem:[#allocation2 + $0x70] sm:$0xff]  ;;  %v40_v45 = vld [vmem:[#allocation2 + $0x78] sm:$0xff] }
  0x1c   :  { %v98_v54 = vmax.f32 %v82_v48, 0.0  ;;  %v301_v56 = vand.u32 2147483647, %v43_v37  ;;  %v303_v57 = vcvt.f32.s32 %v43_v37  ;;  %v99_v59 = vmax.f32 %v83_v51, 0.0 }
  0x1d   :  { %v388_v58 = vsel %vm509_vm3, %v387_v50, %v53_v7  ;;  %v100_v60 = vmax.f32 %v84_v52, 0.0  ;;  %v297_v61 = vand.u32 2147483647, %v296_v53  ;;  %v306_v1 = vand.u32 2147483648, %v43_v37 }
  0x1e   :  { %v85_v62 = vadd.f32 129.0, %v388_v58  ;;  %v114_v63 = vmin.f32 %v98_v54, 255.0  ;;  %v304_v0 = vcvt.s32.f32 %v303_v57  ;;  %v115_v2 = vmin.f32 %v99_v59, 255.0 }
  0x1f   :  { %v116_v3 = vmin.f32 %v100_v60, 255.0  ;;  %v299_v4 = vor.u32 %v298_v49, %v297_v61  ;;  %v309_v5 = vand.u32 2147483647, %v513_v40  ;;  %v311_v10 = vcvt.f32.s32 %v513_v40 }
  0x20   :  { %v101_v6 = vmax.f32 %v85_v62, 0.0  ;;  %v269_v8 = vadd.f32 -129.0, %v114_v63  ;;  %v305_v9 = vand.u32 2147483647, %v304_v0  ;;  %v270_v11 = vadd.f32 -129.0, %v115_v2 }
  0x21   :  { %v271_v12 = vadd.f32 -129.0, %v116_v3  ;;  %v300_v7 = vsel %vm526_vm4, %v299_v4, %v503_v29  ;;  %vm537_vm5 = vcmp.lt.f32.partialorder %v301_v56, 8388608.0  ;;  %v312_v16 = vcvt.s32.f32 %v311_v10 }
  0x22   :  { %v117_v14 = vmin.f32 %v101_v6, 255.0  ;;  %v307_v15 = vor.u32 %v306_v1, %v305_v9  ;;  %v314_v17 = vand.u32 2147483648, %v513_v40  ;;  %v204_v18 = vadd.f32 %v270_v11, %v269_v8 }
  0x23   :  { %v289_v19 = vpack.c.bf16 %v270_v11, %v269_v8  ;;  %vm542_vm6 = vcmp.lt.f32.partialorder %v309_v5, 8388608.0  ;;  %v319_v21 = vcvt.f32.s32 %v518_v44  ;;  %v313_v25 = vand.u32 2147483647, %v312_v16 }
  0x24   :  { %v272_v23 = vadd.f32 -129.0, %v117_v14  ;;  %v308_v24 = vsel %vm537_vm5, %v307_v15, %v43_v37  ;;  %v317_v26 = vand.u32 2147483647, %v518_v44  ;;  %v205_v27 = vadd.f32 %v271_v12, %v204_v18 }
  0x25   :  { %190 = vst [vmem:[#allocation5 + $0x20] sm:$0xff] %v289_v19  ;;  %v320_v28 = vcvt.s32.f32 %v319_v21  ;;  %v322_v29 = vand.u32 2147483648, %v518_v44  ;;  %v74_v30 = vadd.f32 129.0, %v300_v7  ;;  %v315_v33 = vor.u32 %v314_v17, %v313_v25  ;;  %v29_v17 = vld [vmem:[#allocation2 + $0x20] sm:$0xff] }
  0x26   :  { %v290_v32 = vpack.c.bf16 %v272_v23, %v271_v12  ;;  %v75_v34 = vadd.f32 129.0, %v308_v24  ;;  %v54_v35 = vmul.f32 33.361717, %v37_v22  ;;  %v206_v36 = vadd.f32 %v272_v23, %v205_v27 }
  0x27   :  { %v321_v38 = vand.u32 2147483647, %v320_v28  ;;  %v90_v39 = vmax.f32 %v74_v30, 0.0  ;;  %v316_v37 = vsel %vm542_vm6, %v315_v33, %v513_v40  ;;  %vm554_vm7 = vcmp.lt.f32.partialorder %v317_v26, 8388608.0  ;;  %v30_v26 = vld [vmem:[#allocation2 + $0x28] sm:$0xff] }
  0x28   :  { %191 = vst [vmem:[#allocation5 + $0x28] sm:$0xff] %v290_v32  ;;  %v91_v43 = vmax.f32 %v75_v34, 0.0  ;;  %v55_v46 = vmul.f32 33.361717, %v38_v31  ;;  %207 = vadd.xlane.f32.xlu1 %v206_v36  ;;  %v76_v48 = vadd.f32 129.0, %v316_v37  ;;  %v391_v53 = vcvt.f32.s32 %v54_v35 }
  0x29   :  { %v323_v47 = vor.u32 %v322_v29, %v321_v38  ;;  %v106_v49 = vmin.f32 %v90_v39, 255.0  ;;  %v389_v50 = vand.u32 2147483647, %v54_v35  ;;  %v56_v52 = vmul.f32 33.361717, %v39_v41  ;;  %v31_v38 = vld [vmem:[#allocation2 + $0x30] sm:$0xff] }
  0x2a   :  { %v107_v51 = vmin.f32 %v91_v43, 255.0  ;;  %v397_v54 = vand.u32 2147483647, %v55_v46  ;;  %v92_v55 = vmax.f32 %v76_v48, 0.0  ;;  %v561_v57 = vmul.f32 33.361717, %v40_v45 }
  0x2b   :  { %v324_v40 = vsel %vm554_vm7, %v323_v47, %v518_v44  ;;  %v261_v56 = vadd.f32 -129.0, %v106_v49  ;;  %v392_v60 = vcvt.s32.f32 %v391_v53  ;;  %v394_v61 = vand.u32 2147483648, %v54_v35  ;;  %v32_v48 = vld [vmem:[#allocation2 + $0x38] sm:$0xff] }
  0x2c   :  { %v77_v58 = vadd.f32 129.0, %v324_v40  ;;  %v262_v59 = vadd.f32 -129.0, %v107_v51  ;;  %v108_v62 = vmin.f32 %v92_v55, 255.0  ;;  %vm563_vm8 = vcmp.lt.f32.partialorder %v389_v50, 8388608.0 }
  0x2d   :  { %vm567_vm9 = vcmp.lt.f32.partialorder %v397_v54, 8388608.0  ;;  %v399_v1 = vcvt.f32.s32 %v55_v46  ;;  %v393_v4 = vand.u32 2147483647, %v392_v60  ;;  %v402_v8 = vand.u32 2147483648, %v55_v46 }
  0x2e   :  { %v93_v2 = vmax.f32 %v77_v58, 0.0  ;;  %v194_v44 = vadd.f32 %v262_v59, %v261_v56  ;;  %v285_v3 = vpack.c.bf16 %v262_v59, %v261_v56  ;;  %v263_v5 = vadd.f32 -129.0, %v108_v62 }
  0x2f   :  { %v400_v6 = vcvt.s32.f32 %v399_v1  ;;  %v407_v9 = vcvt.f32.s32 %v56_v52  ;;  %v395_v11 = vor.u32 %v394_v61, %v393_v4  ;;  %v405_v12 = vand.u32 2147483647, %v56_v52 }
  0x30   :  { %v109_v10 = vmin.f32 %v93_v2, 255.0  ;;  %186 = vst [vmem:[#allocation5] sm:$0xff] %v285_v3  ;;  %v410_v7 = vand.u32 2147483648, %v56_v52  ;;  %v195_v13 = vadd.f32 %v263_v5, %v194_v44  ;;  %v415_v16 = vcvt.f32.s32 %v561_v57 }
  0x31   :  { %v401_v14 = vand.u32 2147483647, %v400_v6  ;;  %v408_v15 = vcvt.s32.f32 %v407_v9  ;;  %v396_v19 = vsel %vm563_vm8, %v395_v11, %v54_v35  ;;  %v413_v20 = vand.u32 2147483647, %v561_v57 }
  0x32   :  { %v264_v18 = vadd.f32 -129.0, %v109_v10  ;;  %v418_v21 = vand.u32 2147483648, %v561_v57  ;;  %v416_v24 = vcvt.s32.f32 %v415_v16  ;;  %v86_v25 = vadd.f32 129.0, %v396_v19 }
  0x33   :  { %v403_v22 = vor.u32 %v402_v8, %v401_v14  ;;  %v409_v23 = vand.u32 2147483647, %v408_v15  ;;  %vm576_vm10 = vcmp.lt.f32.partialorder %v405_v12, 8388608.0  ;;  %v46_v30 = vmul.f32 33.361717, %v29_v17 }
  0x34   :  { %v286_v27 = vpack.c.bf16 %v264_v18, %v263_v5  ;;  %v196_v28 = vadd.f32 %v264_v18, %v195_v13  ;;  %v417_v33 = vand.u32 2147483647, %v416_v24  ;;  %v102_v34 = vmax.f32 %v86_v25, 0.0 }
  0x35   :  { %v404_v31 = vsel %vm567_vm9, %v403_v22, %v55_v46  ;;  %v411_v32 = vor.u32 %v410_v7, %v409_v23  ;;  %vm582_vm11 = vcmp.lt.f32.partialorder %v413_v20, 8388608.0  ;;  %v47_v39 = vmul.f32 33.361717, %v30_v26 }
  0x36   :  { %187 = vst [vmem:[#allocation5 + $0x8] sm:$0xff] %v286_v27  ;;  %197 = vadd.xlane.f32.xlu0 %v196_v28  ;;  %v87_v36 = vadd.f32 129.0, %v404_v31  ;;  %v327_v41 = vcvt.f32.s32 %v46_v30  ;;  %v419_v42 = vor.u32 %v418_v21, %v417_v33  ;;  %v118_v43 = vmin.f32 %v102_v34, 255.0 }
  0x37   :  { %v412_v37 = vsel %vm576_vm10, %v411_v32, %v56_v52  ;;  %v325_v45 = vand.u32 2147483647, %v46_v30  ;;  %v330_v50 = vand.u32 2147483648, %v46_v30  ;;  %v48_v54 = vmul.f32 33.361717, %v31_v38 }
  0x38   :  { %v88_v46 = vadd.f32 129.0, %v412_v37  ;;  %v103_v47 = vmax.f32 %v87_v36, 0.0  ;;  %v328_v49 = vcvt.s32.f32 %v327_v41  ;;  %v420_v51 = vsel %vm582_vm11, %v419_v42, %v561_v57 }
  0x39   :  { %v273_v53 = vadd.f32 -129.0, %v118_v43  ;;  %v333_v40 = vand.u32 2147483647, %v47_v39  ;;  %v89_v55 = vadd.f32 129.0, %v420_v51  ;;  %v49_v52 = vmul.f32 33.361717, %v32_v48 }
  0x3a   :  { %v104_v56 = vmax.f32 %v88_v46, 0.0  ;;  %v119_v58 = vmin.f32 %v103_v47, 255.0  ;;  %v329_v59 = vand.u32 2147483647, %v328_v49  ;;  %vm591_vm12 = vcmp.lt.f32.partialorder %v325_v45, 8388608.0 }
  0x3b   :  { %v335_v61 = vcvt.f32.s32 %v47_v39  ;;  %v341_v62 = vand.u32 2147483647, %v48_v54  ;;  %v105_v63 = vmax.f32 %v89_v55, 0.0  ;;  %vm595_vm13 = vcmp.lt.f32.partialorder %v333_v40, 8388608.0 }
  0x3c   :  { %v120_v0 = vmin.f32 %v104_v56, 255.0  ;;  %v274_v1 = vadd.f32 -129.0, %v119_v58  ;;  %v331_v2 = vor.u32 %v330_v50, %v329_v59  ;;  %v338_v3 = vand.u32 2147483648, %v47_v39 }
  0x3d   :  { %v336_v44 = vcvt.s32.f32 %v335_v61  ;;  %v343_v4 = vcvt.f32.s32 %v48_v54  ;;  %v121_v5 = vmin.f32 %v105_v63, 255.0  ;;  %v346_v7 = vand.u32 2147483648, %v48_v54 }
  0x3e   :  { %v275_v6 = vadd.f32 -129.0, %v120_v0  ;;  %v291_v8 = vpack.c.bf16 %v274_v1, %v273_v53  ;;  %v209_v9 = vadd.f32 %v274_v1, %v273_v53  ;;  %v332_v10 = vsel %vm591_vm12, %v331_v2, %v46_v30 }
  0x3f   :  { %v337_v11 = vand.u32 2147483647, %v336_v44  ;;  %v344_v12 = vcvt.s32.f32 %v343_v4  ;;  %v276_v13 = vadd.f32 -129.0, %v121_v5  ;;  %vm601_vm14 = vcmp.lt.f32.partialorder %v341_v62, 8388608.0 }
  0x40   :  { %192 = vst [vmem:[#allocation5 + $0x30] sm:$0xff] %v291_v8  ;;  %v210_v14 = vadd.f32 %v275_v6, %v209_v9  ;;  %v351_v16 = vcvt.f32.s32 %v49_v52  ;;  %v349_v19 = vand.u32 2147483647, %v49_v52  ;;  %v78_v20 = vadd.f32 129.0, %v332_v10 }
  0x41   :  { %v339_v17 = vor.u32 %v338_v3, %v337_v11  ;;  %v345_v18 = vand.u32 2147483647, %v344_v12  ;;  %v292_v21 = vpack.c.bf16 %v276_v13, %v275_v6  ;;  %v354_v24 = vand.u32 2147483648, %v49_v52 }
  0x42   :  { %v211_v22 = vadd.f32 %v276_v13, %v210_v14  ;;  %v352_v23 = vcvt.s32.f32 %v351_v16  ;;  %v94_v27 = vmax.f32 %v78_v20, 0.0  ;;  %vm350_vm15 = vcmp.lt.f32.partialorder %v349_v19, 8388608.0 }
  0x43   :  { %v340_v25 = vsel %vm595_vm13, %v339_v17, %v47_v39  ;;  %v347_v26 = vor.u32 %v346_v7, %v345_v18  ;;  %193 = vst [vmem:[#allocation5 + $0x38] sm:$0xff] %v292_v21 }
  0x44   :  { %212 = vadd.xlane.f32.xlu1 %v211_v22  ;;  %v353_v28 = vand.u32 2147483647, %v352_v23  ;;  %v79_v29 = vadd.f32 129.0, %v340_v25  ;;  %v110_v31 = vmin.f32 %v94_v27, 255.0 }
  0x45   :  { %v348_v30 = vsel %vm601_vm14, %v347_v26, %v48_v54 }
  0x46   :  { %v355_v32 = vor.u32 %v354_v24, %v353_v28  ;;  %v80_v33 = vadd.f32 129.0, %v348_v30  ;;  %v95_v34 = vmax.f32 %v79_v29, 0.0  ;;  %v265_v41 = vadd.f32 -129.0, %v110_v31 }
  0x48   :  { %v356_v35 = vsel %vm350_vm15, %v355_v32, %v49_v52  ;;  %v96_v36 = vmax.f32 %v80_v33, 0.0  ;;  %v111_v38 = vmin.f32 %v95_v34, 255.0 }
  0x49   :  { %v81_v37 = vadd.f32 129.0, %v356_v35 }
  0x4a   :  { %v112_v39 = vmin.f32 %v96_v36, 255.0  ;;  %v266_v42 = vadd.f32 -129.0, %v111_v38 }
  0x4b   :  { %v97_v43 = vmax.f32 %v81_v37, 0.0 }
  0x4c   :  { %v267_v45 = vadd.f32 -129.0, %v112_v39  ;;  %v287_v46 = vpack.c.bf16 %v266_v42, %v265_v41  ;;  %v199_v47 = vadd.f32 %v266_v42, %v265_v41 }
  0x4d   :  { %v113_v48 = vmin.f32 %v97_v43, 255.0 }
  0x4e   :  { %188 = vst [vmem:[#allocation5 + $0x10] sm:$0xff] %v287_v46  ;;  %v200_v49 = vadd.f32 %v267_v45, %v199_v47 }
  0x4f   :  { %v268_v50 = vadd.f32 -129.0, %v113_v48 }
  0x51   :  { %v288_v51 = vpack.c.bf16 %v268_v50, %v267_v45  ;;  %v201_v53 = vadd.f32 %v268_v50, %v200_v49 }
  0x53   :  { %189 = vst [vmem:[#allocation5 + $0x18] sm:$0xff] %v288_v51  ;;  %202 = vadd.xlane.f32.xlu0 %v201_v53 }
  0x54   :  { %458 = shalt.err (!%p455_p9)
}
  0x55   :  { %s475_s18 = smov 256   ;;  %s476_s19 = smov 16   ;;  %vm218_vm0 = vcmask 7168  }
  0x56   :  { %251 = dma.vmem_to_hbm [thread:$0]  %s246_s16, 1024, %s625_s1, [#allocation4], %s475_s18, %s475_s18, %s476_s19  }
  0xb1   :  { %v208_v54 = vpop.xlane.xlu1 %207 }
  0xb2   :  { %221 = vst.msk [vmem:[%s626_s2 + $0x10] sm:$0xff] %vm218_vm0, %v208_v54 }
  0xbf   :  { %v198_v40 = vpop.xlane.xlu0 %197 }
  0xc0   :  { %219 = vst.msk [vmem:[%s626_s2] sm:$0xff] %vm218_vm0, %v198_v40 }
  0xcd   :  { %v213_v55 = vpop.xlane.xlu1 %212 }
  0xce   :  { %222 = vst.msk [vmem:[%s626_s2 + $0x18] sm:$0xff] %vm218_vm0, %v213_v55 }
  0xdc   :  { %v203_v56 = vpop.xlane.xlu0 %202 }
  0xdd   :  { %220 = vst.msk [vmem:[%s626_s2 + $0x8] sm:$0xff] %vm218_vm0, %v203_v56 }
  0xde   :  { %469 = dma.done.wait [#allocation4], 1024  }
  0xdf   :  { %470 = vsyncadd [#allocation4], 4294966272 }
  0xe0   :  { %259 = vsyncpa [#allocation3], 1 }
  0xe1   :  { %260 = vsyncpa [#allocation4], 1 }

</bundles_post_ra>
